<compile_context>
chip_gen: v5e
topology: v5e:2x2
jax: 0.10.0
libtpu: 0.0.40
codegen_flags: <defaults>
</compile_context>

<pallas_src>
import math

import numpy as np
import jax
import jax.numpy as jnp
from jax.experimental import pallas as pl
from jax.experimental.pallas import tpu as pltpu


# ---------------------------------------------------------------------------
# Fixed sinusoidal table (identical to the PyTorch __init__ buffer).
# ---------------------------------------------------------------------------
def make_pe_table(max_len, d_model):
    pe = np.zeros((max_len, d_model), dtype=np.float32)
    position = np.arange(0, max_len, dtype=np.float32)[:, None]
    div_term = np.exp(
        np.arange(0, d_model, 2, dtype=np.float32) * -(math.log(10000.0) / d_model))
    pe[:, 0::2] = np.sin(position * div_term)
    pe[:, 1::2] = np.cos(position * div_term)
    return pe[None]  # (1, max_len, d_model), matches the registered buffer


# ---------------------------------------------------------------------------
# Generation-aware tiling parameters.
# ---------------------------------------------------------------------------
def _hw_params():
    try:
        kind = jax.devices()[0].device_kind.lower()
    except Exception:  # pragma: no cover - defensive
        kind = ""
    if "v7" in kind:
        # 2 TCs, 64 MiB physical VMEM, 3.2 TB/s HBM: big blocks but capped.
        return dict(num_tc=2, block_bytes=12 << 20, vmem_limit=40 << 20)
    if "v6" in kind:
        # 1 TC, 128 MiB VMEM: large blocks to amortize per-step overhead.
        return dict(num_tc=1, block_bytes=16 << 20, vmem_limit=64 << 20)
    if "v5" in kind:
        return dict(num_tc=1, block_bytes=8 << 20, vmem_limit=64 << 20)
    # Unknown generation: stay inside the default scoped-VMEM limit.
    return dict(num_tc=1, block_bytes=4 << 20, vmem_limit=None)


def _compiler_params(grid_len, hw):
    kwargs = dict(dimension_semantics=("parallel",) * grid_len)
    if hw["vmem_limit"] is not None:
        kwargs["vmem_limit_bytes"] = hw["vmem_limit"]
    return pltpu.CompilerParams(**kwargs)


def _pick_tb(B, row_bytes, budget, num_tc):
    """Batch rows per output block (double-buffered).  0 => row-tiling fails."""
    tb = max(1, budget // (2 * max(1, row_bytes)))
    if num_tc >= 2 and B >= 16:
        # Keep >= 2 grid steps so a 2-TC chip (v7x) can shard the store work;
        # skipped for small B where sublane alignment would be violated.
        tb = min(tb, -(-B // num_tc))
    tb = min(tb, B)
    if tb < B:
        tb = (tb // 8) * 8  # partial-batch blocks must be sublane-aligned
    return int(tb)


def _pick_tiles(B, n, dsize, budget, num_tc):
    """(tb, tc): batch rows and flattened-lane columns per output block."""
    row_bytes = n * dsize
    if 2 * row_bytes <= budget:
        tb = _pick_tb(B, row_bytes, budget, num_tc)
        if tb >= 1:
            return tb, n
    # One row is too large (or row count can't be sublane-aligned within the
    # budget): tile the flattened lane dim in multiples of 128.
    tb = B if B < 8 else 8
    tc = max(128, (budget // (2 * tb * dsize)) // 128 * 128)
    return int(tb), int(min(tc, n))


# ---------------------------------------------------------------------------
# Kernels (pure lane-dense broadcast stores; no compute beyond the fused add).
# ---------------------------------------------------------------------------
def _bcast_kernel(pe_ref, o_ref):
    # pe_ref: (1, tc); o_ref: (tb, tc)
    o_ref[...] = jnp.broadcast_to(pe_ref[...], o_ref.shape)


def _bcast_add_kernel(pe_ref, x_ref, o_ref):
    # Fused consumer add: o = x + broadcast(pe); encoding never hits HBM.
    o_ref[...] = x_ref[...] + jnp.broadcast_to(pe_ref[...], o_ref.shape)


def _multi_bcast_kernel(*refs):
    # refs = (pe_0..pe_{m-1}, o_0..o_{m-1}); one launch covers all modals.
    m = len(refs) // 2
    for pe_ref, o_ref in zip(refs[:m], refs[m:]):
        o_ref[...] = jnp.broadcast_to(pe_ref[...], o_ref.shape)


# ---------------------------------------------------------------------------
# pallas_call wrappers.
# ---------------------------------------------------------------------------
def _broadcast_flat(slab_flat, batch_size, *, dtype, hw):
    """slab_flat: (1, n) in `dtype`.  Returns (batch_size, n)."""
    n = int(slab_flat.shape[1])
    dsize = np.dtype(dtype).itemsize
    tb, tc = _pick_tiles(batch_size, n, dsize, hw["block_bytes"], hw["num_tc"])
    grid = (pl.cdiv(batch_size, tb), pl.cdiv(n, tc))
    cost = pl.CostEstimate(flops=0, transcendentals=0,
                           bytes_accessed=(batch_size + 1) * n * dsize)
    # TODO(synk): the pe slab's index_map is constant, so pipeline_mode=
    # pl.Buffered(1) on its BlockSpec would reclaim one n*dsize VMEM buffer.
    return pl.pallas_call(
        _bcast_kernel,
        out_shape=jax.ShapeDtypeStruct((batch_size, n), dtype),
        grid=grid,
        in_specs=[pl.BlockSpec((1, tc), lambda b, c: (0, c))],
        out_specs=pl.BlockSpec((tb, tc), lambda b, c: (b, c)),
        compiler_params=_compiler_params(len(grid), hw),
        cost_estimate=cost,
    )(slab_flat)


def _broadcast_multi(slabs_flat, batch_size, *, dtype, hw):
    """One launch, multiple outputs: [(1, n_i)] -> [(batch_size, n_i)]."""
    ns = [int(s.shape[1]) for s in slabs_flat]
    dsize = np.dtype(dtype).itemsize
    total_row_bytes = sum(ns) * dsize
    tb = _pick_tb(batch_size, total_row_bytes, hw["block_bytes"], hw["num_tc"])
    if tb < 1:
        # TODO(synk): column-tile the multi-output path for enormous slabs;
        # realistic separate=True slabs are tiny so this fallback is enough.
        tb = batch_size if batch_size < 8 else 8
    grid = (pl.cdiv(batch_size, tb),)
    in_specs = [pl.BlockSpec((1, n), lambda b: (0, 0)) for n in ns]
    out_specs = [pl.BlockSpec((tb, n), lambda b: (b, 0)) for n in ns]
    out_shape = tuple(jax.ShapeDtypeStruct((batch_size, n), dtype) for n in ns)
    cost = pl.CostEstimate(flops=0, transcendentals=0,
                           bytes_accessed=(batch_size + 1) * sum(ns) * dsize)
    outs = pl.pallas_call(
        _multi_bcast_kernel,
        out_shape=out_shape,
        grid=grid,
        in_specs=in_specs,
        out_specs=out_specs,
        compiler_params=_compiler_params(len(grid), hw),
        cost_estimate=cost,
    )(*slabs_flat)
    return list(outs)


# ---------------------------------------------------------------------------
# Trace-time slab construction (the gather is a shape-only constant).
# ---------------------------------------------------------------------------
def _build_joint_slab(modal_feats, pe2d):
    d_model = pe2d.shape[1]
    D = int(modal_feats[0].shape[1]) - 1
    slabs = []
    for modal in modal_feats:
        t = int(modal.shape[1]) - 1
        indices = np.linspace(0, D - 1, t).astype(np.int32)
        slab = np.zeros((t + 1, d_model), dtype=np.float32)
        slab[1:] = pe2d[indices]          # row 0 (Global) stays zero
        slabs.append(slab)
    return np.concatenate(slabs, axis=0)  # (T, E)


# ---------------------------------------------------------------------------
# Forward pass (mirrors TemporalEncoding.forward).
# ---------------------------------------------------------------------------
def temporal_encoding(modal_feats, pe, *, separate=False, dtype=jnp.float32):
    """modal_feats: list of (B, t_i(+1), E); pe: (1, max_len, E) buffer."""
    batch_size = int(modal_feats[0].shape[0])
    d_model = int(pe.shape[-1])
    pe2d = np.asarray(pe).reshape(-1, d_model)      # trace-time constant
    hw = _hw_params()

    if not separate:
        full = _build_joint_slab(modal_feats, pe2d)               # (T, E)
        T = full.shape[0]
        slab_flat = jnp.asarray(full.reshape(1, T * d_model), dtype=dtype)
        out = _broadcast_flat(slab_flat, batch_size, dtype=dtype, hw=hw)
        return out.reshape(batch_size, T, d_model)
    else:
        D = int(modal_feats[0].shape[1])
        slabs_flat, ts = [], []
        for modal in modal_feats:
            t = int(modal.shape[1])
            indices = np.linspace(0, D - 1, t).astype(np.int32)
            slab = pe2d[indices]                                   # (t, E)
            ts.append(t)
            slabs_flat.append(jnp.asarray(slab.reshape(1, t * d_model), dtype=dtype))
        outs = _broadcast_multi(slabs_flat, batch_size, dtype=dtype, hw=hw)
        return [o.reshape(batch_size, t, d_model) for o, t in zip(outs, ts)]


def temporal_encoding_add(modal_feats, pe, *, dtype=None):
    """Fused path (review item #1): concat(modal_feats, axis=1) + encoding,
    computed in one kernel so the (B, T, E) encoding never round-trips HBM.
    (separate=False semantics; the plain API above keeps module parity.)"""
    batch_size = int(modal_feats[0].shape[0])
    d_model = int(pe.shape[-1])
    out_dtype = dtype or modal_feats[0].dtype
    pe2d = np.asarray(pe).reshape(-1, d_model)
    hw = _hw_params()

    full = _build_joint_slab(modal_feats, pe2d)                   # (T, E)
    T = full.shape[0]
    n = T * d_model
    slab_flat = jnp.asarray(full.reshape(1, n), dtype=out_dtype)
    x = jnp.concatenate(modal_feats, axis=1).astype(out_dtype).reshape(batch_size, n)

    dsize = np.dtype(out_dtype).itemsize
    # x and out are both double-buffered -> halve the per-block budget.
    tb, tc = _pick_tiles(batch_size, n, dsize, hw["block_bytes"] // 2, hw["num_tc"])
    grid = (pl.cdiv(batch_size, tb), pl.cdiv(n, tc))
    cost = pl.CostEstimate(flops=batch_size * n, transcendentals=0,
                           bytes_accessed=(2 * batch_size + 1) * n * dsize)
    out = pl.pallas_call(
        _bcast_add_kernel,
        out_shape=jax.ShapeDtypeStruct((batch_size, n), out_dtype),
        grid=grid,
        in_specs=[pl.BlockSpec((1, tc), lambda b, c: (0, c)),
                  pl.BlockSpec((tb, tc), lambda b, c: (b, c))],
        out_specs=pl.BlockSpec((tb, tc), lambda b, c: (b, c)),
        compiler_params=_compiler_params(len(grid), hw),
        cost_estimate=cost,
    )(slab_flat, x)
    return out.reshape(batch_size, T, d_model)


# ---------------------------------------------------------------------------
# Pure numpy reference mirroring the PyTorch loop literally.
# ---------------------------------------------------------------------------
def _reference(modal_feats, pe, *, separate=False):
    batch_size = int(modal_feats[0].shape[0])
    d_model = int(pe.shape[-1])
    pe2d = np.asarray(pe).reshape(-1, d_model)
    if not separate:
        D = int(modal_feats[0].shape[1]) - 1
        temp = []
        for modal in modal_feats:
            t = int(modal.shape[1]) - 1
            indices = np.linspace(0, D - 1, t).astype(np.int32)
            _pe = np.zeros((t + 1, d_model), dtype=np.float32)
            for i, idx in zip(range(t), indices):
                _pe[i + 1] = pe2d[idx]
            temp.append(_pe)
        temp = np.concatenate(temp, axis=0)
        return np.broadcast_to(temp[None], (batch_size,) + temp.shape)
    else:
        D = int(modal_feats[0].shape[1])
        outs = []
        for modal in modal_feats:
            t = int(modal.shape[1])
            indices = np.linspace(0, D - 1, t).astype(np.int32)
            _pe = np.zeros((t, d_model), dtype=np.float32)
            for i, idx in zip(range(t), indices):
                _pe[i] = pe2d[idx]
            outs.append(np.broadcast_to(_pe[None], (batch_size,) + _pe.shape))
        return outs


if __name__ == "__main__":
    key = jax.random.PRNGKey(0)
    k0, k1, k2, k3 = jax.random.split(key, 4)

    # ------------------- Case 1: lane-dense E = 128 -------------------
    d_model, max_len, batch = 128, 64, 4
    lens = [9, 7]          # each includes the Global token -> T = 16
    pe = jnp.asarray(make_pe_table(max_len, d_model))   # (1, max_len, E)
    modal_feats = [
        jax.random.normal(k0, (batch, lens[0], d_model), dtype=jnp.float32),
        jax.random.normal(k1, (batch, lens[1], d_model), dtype=jnp.float32),
    ]

    out = jax.block_until_ready(temporal_encoding(modal_feats, pe, separate=False))
    ref = _reference(modal_feats, pe, separate=False)
    assert out.shape == (batch, sum(lens), d_model)
    assert np.allclose(np.asarray(out), ref, atol=1e-6, rtol=1e-6)

    outs = temporal_encoding(modal_feats, pe, separate=True)
    outs = [jax.block_until_ready(o) for o in outs]
    refs = _reference(modal_feats, pe, separate=True)
    for o, r, t in zip(outs, refs, lens):
        assert o.shape == (batch, t, d_model)
        assert np.allclose(np.asarray(o), r, atol=1e-6, rtol=1e-6)

    # bf16 consumer-dtype output (halves HBM bytes written)
    out_bf = jax.block_until_ready(
        temporal_encoding(modal_feats, pe, separate=False, dtype=jnp.bfloat16))
    assert out_bf.dtype == jnp.bfloat16
    assert np.allclose(np.asarray(out_bf, dtype=np.float32), ref, atol=1e-2, rtol=1e-2)

    # Fused add: encoding never materialized in HBM
    fused = jax.block_until_ready(temporal_encoding_add(modal_feats, pe))
    ref_add = np.concatenate([np.asarray(m) for m in modal_feats], axis=1) + ref
    assert np.allclose(np.asarray(fused), ref_add, atol=1e-5, rtol=1e-5)

    # -- Case 2: E not a multiple of 128, t_i not a multiple of 8, t_i = 1 --
    d_model2, batch2 = 96, 2
    lens2 = [6, 2]          # second modal: t = 1 after removing the Global row
    pe2 = jnp.asarray(make_pe_table(max_len, d_model2))
    modal_feats2 = [
        jax.random.normal(k2, (batch2, lens2[0], d_model2), dtype=jnp.float32),
        jax.random.normal(k3, (batch2, lens2[1], d_model2), dtype=jnp.float32),
    ]
    out2 = jax.block_until_ready(temporal_encoding(modal_feats2, pe2, separate=False))
    ref2 = _reference(modal_feats2, pe2, separate=False)
    assert out2.shape == (batch2, sum(lens2), d_model2)
    assert np.allclose(np.asarray(out2), ref2, atol=1e-6, rtol=1e-6)

    outs2 = temporal_encoding(modal_feats2, pe2, separate=True)
    outs2 = [jax.block_until_ready(o) for o in outs2]
    refs2 = _reference(modal_feats2, pe2, separate=True)
    for o, r, t in zip(outs2, refs2, lens2):
        assert o.shape == (batch2, t, d_model2)
        assert np.allclose(np.asarray(o), r, atol=1e-6, rtol=1e-6)

    print("KERNEL_OK")
</pallas_src>

<mosaic_0001>
module attributes {stable_mosaic.version = 11 : i64} {
  func.func @_bcast_kernel(%arg0: i32, %arg1: i32, %arg2: memref<1x2048xf32, #tpu.memory_space<vmem>>, %arg3: memref<4x2048xf32, #tpu.memory_space<vmem>>) attributes {dimension_semantics = [#tpu.dimension_semantics<parallel>, #tpu.dimension_semantics<parallel>], iteration_bounds = array<i64: 1, 1>, scalar_prefetch = 0 : i64, scratch_operands = 0 : i64, tpu.core_type = #tpu.core_type<tc>, window_params = [{transform_indices = @transform_0, window_bounds = array<i64: 1, 2048>}, {transform_indices = @transform_1, window_bounds = array<i64: 4, 2048>}]} {
    %c0 = arith.constant 0 : index
    %c0_0 = arith.constant 0 : index
    %0 = vector.load %arg2[%c0, %c0_0] : memref<1x2048xf32, #tpu.memory_space<vmem>>, vector<1x2048xf32>
    %1 = vector.shape_cast %0 : vector<1x2048xf32> to vector<1x2048xf32>
    %2 = vector.broadcast %1 : vector<1x2048xf32> to vector<4x2048xf32>
    %c0_1 = arith.constant 0 : index
    %c0_2 = arith.constant 0 : index
    %3 = vector.load %arg3[%c0_1, %c0_2] : memref<4x2048xf32, #tpu.memory_space<vmem>>, vector<4x2048xf32>
    tpu.vector_store %arg3[%c0_1, %c0_2], %2 {strides = array<i32>} : memref<4x2048xf32, #tpu.memory_space<vmem>>, vector<4x2048xf32>,
    return
  }
  func.func @transform_0(%arg0: i32, %arg1: i32) -> (i32, i32) {
    %c0_i32 = arith.constant 0 : i32
    %c0_i32_0 = arith.constant 0 : i32
    return %c0_i32, %arg1 : i32, i32
  }
  func.func @transform_1(%arg0: i32, %arg1: i32) -> (i32, i32) {
    %c0_i32 = arith.constant 0 : i32
    return %arg0, %arg1 : i32, i32
  }
}

</mosaic_0001>

<bundles_post_ra>
// kernel: tpu_custom_call.1
= control target key start
LH: loop header
LB: loop body
LE: loop exit
PB: predicated region body
PF: predicated region fallthrough
CT: control target
= control target key end

     0   :  { %6 = vsyncpa [#allocation3], 0  ;;  %s173_s0 = inlined_call_operand.hbm [shape: f32[1,2048], index: 0, kind: input, shape index: {}]   ;;  %s174_s1 = inlined_call_operand.hbm [shape: f32[4,2048], index: 1, kind: output, shape index: {}]  }
   0x1   :  { %7 = vsyncpa [#allocation4], 0  ;;  %s13_s8 = sshll.u32 %s173_s0, 4  ;;  %s147_s9 = smov [#allocation2]   ;;  %s14_s8 = int_to_ptr.hbm [resolvable:$true] %s13_s8 }
   0x2   :  { %s15_s10 = sshll.u32 %s147_s9, 4  ;;  %s16_s10 = int_to_ptr.vmem [resolvable:$true] %s15_s10 }
   0x3   :  { %18 = dma.hbm_to_vmem [thread:$0]  %s14_s8, 256, %s16_s10, [#allocation3]  }
   0x4   :  { %143 = dma.done.wait [#allocation3], 256  }
   0x5   :  { %144 = vsyncadd [#allocation3], 4294967040  ;;  %v23_v0 = vld [vmem:[#allocation2] sm:$0xff]  ;;  %vm51_vm0 = vcmask 1043456   ;;  %v24_v1 = vld [vmem:[#allocation2 + $0x8] sm:$0xff]  ;;  %s148_s0 = smov [#allocation5]  }
   0x6   :  { %v27_v2 = vperm.slane %v23_v0, 0  ;;  %v28_v3 = vperm.slane %v23_v0, 1  ;;  %v29_v4 = vperm.slane %v23_v0, 2  ;;  %v30_v5 = vperm.slane %v23_v0, 3  ;;  %s81_s11 = sshll.u32 %s148_s0, 4  ;;  %s83_s14 = sshll.u32 %s174_s1, 4  ;;  %s82_s11 = int_to_ptr.vmem [resolvable:$true] %s81_s11  ;;  %s84_s14 = int_to_ptr.hbm [resolvable:$true] %s83_s14 }
   0x7   :  { %v31_v6 = vperm.slane %v23_v0, 4  ;;  %v32_v7 = vperm.slane %v23_v0, 5  ;;  %v33_v8 = vperm.slane %v23_v0, 6  ;;  %v34_v9 = vperm.slane %v23_v0, 7 }
   0x8   :  { %v43_v10 = vrot.slane %v28_v3, 4  ;;  %v44_v11 = vrot.slane %v30_v5, 4  ;;  %v35_v12 = vperm.slane %v24_v1, 0  ;;  %v36_v13 = vperm.slane %v24_v1, 1 }
   0x9   :  { %v45_v14 = vrot.slane %v32_v7, 4  ;;  %v46_v15 = vrot.slane %v34_v9, 4  ;;  %v37_v16 = vperm.slane %v24_v1, 2  ;;  %v38_v17 = vperm.slane %v24_v1, 3 }
   0xa   :  { %v52_v18 = vsel %vm51_vm0, %v27_v2, %v43_v10  ;;  %v53_v19 = vsel %vm51_vm0, %v29_v4, %v44_v11  ;;  %v47_v20 = vrot.slane %v36_v13, 4  ;;  %v39_v21 = vperm.slane %v24_v1, 4 }
   0xb   :  { %68 = vst [vmem:[#allocation5] sm:$0xff] %v52_v18  ;;  %v54_v22 = vsel %vm51_vm0, %v31_v6, %v45_v14  ;;  %v55_v23 = vsel %vm51_vm0, %v33_v8, %v46_v15  ;;  %v48_v24 = vrot.slane %v38_v17, 4  ;;  %v40_v25 = vperm.slane %v24_v1, 5 }
   0xc   :  { %69 = vst [vmem:[#allocation5 + $0x8] sm:$0xff] %v53_v19  ;;  %v56_v26 = vsel %vm51_vm0, %v35_v12, %v47_v20  ;;  %v41_v27 = vperm.slane %v24_v1, 6  ;;  %v42_v28 = vperm.slane %v24_v1, 7 }
   0xd   :  { %70 = vst [vmem:[#allocation5 + $0x10] sm:$0xff] %v54_v22  ;;  %v57_v29 = vsel %vm51_vm0, %v37_v16, %v48_v24  ;;  %v49_v30 = vrot.slane %v40_v25, 4 }
   0xe   :  { %71 = vst [vmem:[#allocation5 + $0x18] sm:$0xff] %v55_v23  ;;  %v50_v31 = vrot.slane %v42_v28, 4 }
   0xf   :  { %72 = vst [vmem:[#allocation5 + $0x20] sm:$0xff] %v56_v26  ;;  %v58_v32 = vsel %vm51_vm0, %v39_v21, %v49_v30 }
  0x10   :  { %73 = vst [vmem:[#allocation5 + $0x28] sm:$0xff] %v57_v29  ;;  %v59_v33 = vsel %vm51_vm0, %v41_v27, %v50_v31 }
  0x11   :  { %74 = vst [vmem:[#allocation5 + $0x30] sm:$0xff] %v58_v32 }
  0x12   :  { %75 = vst [vmem:[#allocation5 + $0x38] sm:$0xff] %v59_v33 }
  0x13   :  { %86 = dma.vmem_to_hbm [thread:$0]  %s82_s11, 1024, %s84_s14, [#allocation4]  }
  0x14   :  { %145 = dma.done.wait [#allocation4], 1024  }
  0x15   :  { %146 = vsyncadd [#allocation4], 4294966272 }
  0x16   :  { %91 = vsyncpa [#allocation3], 1 }
  0x17   :  { %92 = vsyncpa [#allocation4], 1 }

</bundles_post_ra>
